<compile_context>
chip_gen: v6e
topology: v6e:2x2x1
jax: 0.10.0
libtpu: 0.0.40
codegen_flags: <defaults>
</compile_context>

<pallas_src>
import jax
import jax.numpy as jnp
from jax import lax
from jax.experimental import pallas as pl
from jax.experimental.pallas import tpu as pltpu

_MAX_BATCH_TILE = 128      # per-grid-step batch rows (<= MXU row capacity)
_UNROLL_BATCH_LIMIT = 64   # fully unroll the T loop below this per-tile batch


def _cirrnn_kernel(x_ref, w_ref, b_ref, out_ref):
    bt, T, _ = x_ref.shape          # (batch_tile, T, 1)
    H = w_ref.shape[1]
    O = out_ref.shape[1]

    # --- single loads of the packed operands (3 entry DMAs total) ----------
    w_hh0t = w_ref[0]               # (H, H)  = W_hh0.T
    w_ih1t = w_ref[1]               # (H, H)  = W_ih1.T
    w_hh1t = w_ref[2]               # (H, H)  = W_hh1.T
    w_fct = w_ref[3]                # (H, H)  = W_fc.T, lanes [O:] zero-padded

    bias = b_ref[...]               # (4, H), one load
    b0_row = bias[0:1, :]           # b_ih0 + b_hh0
    b1_row = bias[1:2, :]           # b_ih1 + b_hh1
    w_ih0_row = bias[2:3, :]        # W_ih0.T (input_dim == 1 -> single row)
    b_fc_row = bias[3:4, :]         # b_fc, lanes [O:] zero-padded

    # Hoisted broadcast (JAX does not CSE broadcast_in_dim inside the loop).
    b1_b = jnp.broadcast_to(b1_row, (bt, H))

    x_all = x_ref[...]              # (bt, T, 1) -- loaded exactly once

    def step(h1, h2, xp_t):
        # layer 0 (input projection + both biases already folded into xp_t)
        h1 = jnp.tanh(xp_t
                      + jnp.dot(h1, w_hh0t, preferred_element_type=jnp.float32))
        # layer 1
        h2 = jnp.tanh(jnp.dot(h1, w_ih1t, preferred_element_type=jnp.float32)
                      + jnp.dot(h2, w_hh1t, preferred_element_type=jnp.float32)
                      + b1_b)
        return h1, h2

    h1 = jnp.zeros((bt, H), jnp.float32)
    h2 = jnp.zeros((bt, H), jnp.float32)

    if bt <= _UNROLL_BATCH_LIMIT:
        # Layer-0 projection for all T steps at once with fused bias: D_in == 1
        # so this is a pure VPU broadcast-multiply, fully off the recurrence
        # critical path.
        xproj = (x_all * w_ih0_row.reshape(1, 1, H)
                 + b0_row.reshape(1, 1, H))                 # (bt, T, H)
        # Small per-tile batch: static unroll gives the scheduler cross-step
        # visibility (the h2 matmuls overlap the next step's h1 chain).
        for t in range(T):
            h1, h2 = step(h1, h2, xproj[:, t, :])
    else:
        # Large per-tile batch: rolled loop bounds vreg live ranges (h1/h2 are
        # 16+ vregs each at bt >= 128); compute the projection per step.
        def body(t, carry):
            h1, h2 = carry
            x_t = lax.dynamic_slice_in_dim(x_all, t, 1, axis=1)  # (bt, 1, 1)
            xp_t = x_t.reshape(bt, 1) * w_ih0_row + b0_row       # (bt, H)
            return step(h1, h2, xp_t)
        h1, h2 = lax.fori_loop(0, T, body, (h1, h2))

    # Final Linear on the last step's top-layer hidden state; the fc weight is
    # lane-padded to (H, H) with zeros so the dot stays tile-shaped, then only
    # the first O lanes are stored.
    out = jnp.dot(h2, w_fct, preferred_element_type=jnp.float32) + b_fc_row
    out_ref[...] = out[:, :O]


def prepare_params(params):
    """One-time repack at param-load time (NOT on the per-call path).

    Produces the two operand slabs the kernel consumes:
      w_slab: (4, H, H) = [W_hh0.T, W_ih1.T, W_hh1.T, lane-pad(W_fc.T)]
      b_slab: (4, H)    = [b_ih0+b_hh0, b_ih1+b_hh1, W_ih0.T row, lane-pad(b_fc)]
    """
    H = params["w_hh0"].shape[0]
    D_in = params["w_ih0"].shape[1]
    O = params["w_fc"].shape[0]
    if D_in != 1:
        # TODO(synk): generalize the packed layer-0 projection for input_dim > 1.
        raise NotImplementedError("kernel packs W_ih0 as one broadcast row "
                                  "(requires input_dim == 1)")
    w_fct_pad = jnp.zeros((H, H), jnp.float32).at[:, :O].set(
        params["w_fc"].T.astype(jnp.float32))
    w_slab = jnp.stack([params["w_hh0"].T, params["w_ih1"].T,
                        params["w_hh1"].T, w_fct_pad]).astype(jnp.float32)
    b_fc_pad = jnp.zeros((H,), jnp.float32).at[:O].set(
        params["b_fc"].astype(jnp.float32))
    b_slab = jnp.stack([params["b_ih0"] + params["b_hh0"],
                        params["b_ih1"] + params["b_hh1"],
                        params["w_ih0"][:, 0],
                        b_fc_pad]).astype(jnp.float32)
    return {"w_slab": w_slab, "b_slab": b_slab, "output_dim": O}


def cirrnn_forward(x, prepped):
    """x: (B, T, 1) float32 (PyTorch batch_first convention), passed as-is."""
    B, T, D_in = x.shape
    w_slab, b_slab = prepped["w_slab"], prepped["b_slab"]
    H = w_slab.shape[1]
    O = prepped["output_dim"]

    # Batch tiling: one grid step per batch tile; "parallel" lets v7x shard the
    # tiles across both TensorCores (a no-op serial loop on v5e/v6e).
    bt = B if B <= _MAX_BATCH_TILE else _MAX_BATCH_TILE
    if B % bt != 0:
        raise ValueError(f"batch {B} must be a multiple of the batch tile {bt}")
    grid = (B // bt,)

    return pl.pallas_call(
        _cirrnn_kernel,
        out_shape=jax.ShapeDtypeStruct((B, O), jnp.float32),
        grid=grid,
        in_specs=[
            pl.BlockSpec((bt, T, D_in), lambda i: (i, 0, 0)),   # x batch tile
            pl.BlockSpec((4, H, H), lambda i: (0, 0, 0)),       # weight slab
            pl.BlockSpec((4, H), lambda i: (0, 0)),             # bias slab
        ],
        out_specs=pl.BlockSpec((bt, O), lambda i: (i, 0)),
        compiler_params=pltpu.CompilerParams(
            dimension_semantics=("parallel",)),
    )(x, w_slab, b_slab)


def _xavier_normal(key, shape):
    fan_out, fan_in = shape
    std = (2.0 / (fan_in + fan_out)) ** 0.5
    return std * jax.random.normal(key, shape, jnp.float32)


def init_params(key, input_dim, hidden_dim, output_dim):
    ks = jax.random.split(key, 5)
    return {
        # layer 0
        "w_ih0": _xavier_normal(ks[0], (hidden_dim, input_dim)),
        "w_hh0": _xavier_normal(ks[1], (hidden_dim, hidden_dim)),
        "b_ih0": jnp.zeros((hidden_dim,), jnp.float32),
        "b_hh0": jnp.zeros((hidden_dim,), jnp.float32),
        # layer 1
        "w_ih1": _xavier_normal(ks[2], (hidden_dim, hidden_dim)),
        "w_hh1": _xavier_normal(ks[3], (hidden_dim, hidden_dim)),
        "b_ih1": jnp.zeros((hidden_dim,), jnp.float32),
        "b_hh1": jnp.zeros((hidden_dim,), jnp.float32),
        # fc
        "w_fc": _xavier_normal(ks[4], (output_dim, hidden_dim)),
        "b_fc": jnp.zeros((output_dim,), jnp.float32),
    }


def cirrnn_reference(x, p):
    """Pure-JAX reference matching torch.nn.RNN(batch_first=True) + Linear."""
    B, T, _ = x.shape
    H = p["w_hh0"].shape[0]
    h1 = jnp.zeros((B, H), jnp.float32)
    h2 = jnp.zeros((B, H), jnp.float32)
    for t in range(T):
        x_t = x[:, t, :]
        h1 = jnp.tanh(x_t @ p["w_ih0"].T + p["b_ih0"]
                      + h1 @ p["w_hh0"].T + p["b_hh0"])
        h2 = jnp.tanh(h1 @ p["w_ih1"].T + p["b_ih1"]
                      + h2 @ p["w_hh1"].T + p["b_hh1"])
    return h2 @ p["w_fc"].T + p["b_fc"]


if __name__ == "__main__":
    input_dim, hidden_dim, output_dim, num_layers = 1, 50, 3, 2
    B, T = 2, 8

    key = jax.random.PRNGKey(0)
    k_params, k_x = jax.random.split(key)
    params = init_params(k_params, input_dim, hidden_dim, output_dim)
    x = jax.random.normal(k_x, (B, T, input_dim), jnp.float32)

    # One-time param repack (load time); the per-call path is just pallas_call.
    prepped = prepare_params(params)

    out = jax.block_until_ready(cirrnn_forward(x, prepped))
    ref = cirrnn_reference(x, params)
    assert out.shape == (B, output_dim)
    assert jnp.allclose(out, ref, atol=1e-5, rtol=1e-5)
    print("KERNEL_OK")
</pallas_src>

<mosaic_0001>
module attributes {stable_mosaic.version = 11 : i64} {
  func.func @_cirrnn_kernel(%arg0: i32, %arg1: memref<2x8x1xf32, #tpu.memory_space<vmem>>, %arg2: memref<4x50x50xf32, #tpu.memory_space<vmem>>, %arg3: memref<4x50xf32, #tpu.memory_space<vmem>>, %arg4: memref<2x3xf32, #tpu.memory_space<vmem>>) attributes {dimension_semantics = [#tpu.dimension_semantics<parallel>], iteration_bounds = array<i64: 1>, scalar_prefetch = 0 : i64, scratch_operands = 0 : i64, tpu.core_type = #tpu.core_type<tc>, window_params = [{transform_indices = @transform_0, window_bounds = array<i64: 2, 8, 1>}, {pipeline_mode = #tpu.pipeline_mode<synchronous>, transform_indices = @transform_1, window_bounds = array<i64: 4, 50, 50>}, {pipeline_mode = #tpu.pipeline_mode<synchronous>, transform_indices = @transform_2, window_bounds = array<i64: 4, 50>}, {transform_indices = @transform_3, window_bounds = array<i64: 2, 3>}]} {
    %c0 = arith.constant 0 : index
    %c0_0 = arith.constant 0 : index
    %c0_1 = arith.constant 0 : index
    %0 = vector.load %arg2[%c0, %c0_0, %c0_1] : memref<4x50x50xf32, #tpu.memory_space<vmem>>, vector<1x50x50xf32>
    %1 = vector.shape_cast %0 : vector<1x50x50xf32> to vector<50x50xf32>
    %c1 = arith.constant 1 : index
    %c0_2 = arith.constant 0 : index
    %c0_3 = arith.constant 0 : index
    %2 = vector.load %arg2[%c1, %c0_2, %c0_3] : memref<4x50x50xf32, #tpu.memory_space<vmem>>, vector<1x50x50xf32>
    %3 = vector.shape_cast %2 : vector<1x50x50xf32> to vector<50x50xf32>
    %c2 = arith.constant 2 : index
    %c0_4 = arith.constant 0 : index
    %c0_5 = arith.constant 0 : index
    %4 = vector.load %arg2[%c2, %c0_4, %c0_5] : memref<4x50x50xf32, #tpu.memory_space<vmem>>, vector<1x50x50xf32>
    %5 = vector.shape_cast %4 : vector<1x50x50xf32> to vector<50x50xf32>
    %c3 = arith.constant 3 : index
    %c0_6 = arith.constant 0 : index
    %c0_7 = arith.constant 0 : index
    %6 = vector.load %arg2[%c3, %c0_6, %c0_7] : memref<4x50x50xf32, #tpu.memory_space<vmem>>, vector<1x50x50xf32>
    %7 = vector.shape_cast %6 : vector<1x50x50xf32> to vector<50x50xf32>
    %c0_8 = arith.constant 0 : index
    %c0_9 = arith.constant 0 : index
    %8 = vector.load %arg3[%c0_8, %c0_9] : memref<4x50xf32, #tpu.memory_space<vmem>>, vector<4x50xf32>
    %9 = vector.extract_strided_slice %8 {offsets = [0, 0], sizes = [1, 50], strides = [1, 1]} : vector<4x50xf32> to vector<1x50xf32>
    %10 = vector.extract_strided_slice %8 {offsets = [1, 0], sizes = [1, 50], strides = [1, 1]} : vector<4x50xf32> to vector<1x50xf32>
    %11 = vector.extract_strided_slice %8 {offsets = [2, 0], sizes = [1, 50], strides = [1, 1]} : vector<4x50xf32> to vector<1x50xf32>
    %12 = vector.extract_strided_slice %8 {offsets = [3, 0], sizes = [1, 50], strides = [1, 1]} : vector<4x50xf32> to vector<1x50xf32>
    %13 = vector.shape_cast %10 : vector<1x50xf32> to vector<1x50xf32>
    %14 = vector.broadcast %13 : vector<1x50xf32> to vector<2x50xf32>
    %c0_10 = arith.constant 0 : index
    %c0_11 = arith.constant 0 : index
    %c0_12 = arith.constant 0 : index
    %15 = vector.load %arg1[%c0_10, %c0_11, %c0_12] : memref<2x8x1xf32, #tpu.memory_space<vmem>>, vector<2x8x1xf32>
    %cst = arith.constant 0.000000e+00 : f32
    %16 = vector.broadcast %cst : f32 to vector<2x50xf32>
    %cst_13 = arith.constant 0.000000e+00 : f32
    %17 = vector.broadcast %cst_13 : f32 to vector<2x50xf32>
    %18 = vector.shape_cast %11 : vector<1x50xf32> to vector<1x1x50xf32>
    %19 = vector.broadcast %15 : vector<2x8x1xf32> to vector<2x8x50xf32>
    %20 = vector.broadcast %18 : vector<1x1x50xf32> to vector<2x8x50xf32>
    %21 = arith.mulf %19, %20 : vector<2x8x50xf32>
    %22 = vector.shape_cast %9 : vector<1x50xf32> to vector<1x1x50xf32>
    %23 = vector.broadcast %22 : vector<1x1x50xf32> to vector<2x8x50xf32>
    %24 = arith.addf %21, %23 : vector<2x8x50xf32>
    %25 = vector.extract_strided_slice %24 {offsets = [0, 0, 0], sizes = [2, 1, 50], strides = [1, 1, 1]} : vector<2x8x50xf32> to vector<2x1x50xf32>
    %26 = vector.shape_cast %25 : vector<2x1x50xf32> to vector<2x50xf32>
    %cst_14 = arith.constant dense<0.000000e+00> : vector<2x50xf32>
    %27 = tpu.matmul %16, %1, %cst_14 {dimension_numbers = #tpu.dot_dimension_numbers<[1], [0], [0], [1], [0, 0, 1, 1], [], []>} : vector<2x50xf32>, vector<50x50xf32>, vector<2x50xf32> -> vector<2x50xf32>
    %28 = arith.addf %26, %27 : vector<2x50xf32>
    %29 = math.tanh %28 : vector<2x50xf32>
    %cst_15 = arith.constant dense<0.000000e+00> : vector<2x50xf32>
    %30 = tpu.matmul %29, %3, %cst_15 {dimension_numbers = #tpu.dot_dimension_numbers<[1], [0], [0], [1], [0, 0, 1, 1], [], []>} : vector<2x50xf32>, vector<50x50xf32>, vector<2x50xf32> -> vector<2x50xf32>
    %cst_16 = arith.constant dense<0.000000e+00> : vector<2x50xf32>
    %31 = tpu.matmul %17, %5, %cst_16 {dimension_numbers = #tpu.dot_dimension_numbers<[1], [0], [0], [1], [0, 0, 1, 1], [], []>} : vector<2x50xf32>, vector<50x50xf32>, vector<2x50xf32> -> vector<2x50xf32>
    %32 = arith.addf %30, %31 : vector<2x50xf32>
    %33 = arith.addf %32, %14 : vector<2x50xf32>
    %34 = math.tanh %33 : vector<2x50xf32>
    %35 = vector.extract_strided_slice %24 {offsets = [0, 1, 0], sizes = [2, 1, 50], strides = [1, 1, 1]} : vector<2x8x50xf32> to vector<2x1x50xf32>
    %36 = vector.shape_cast %35 : vector<2x1x50xf32> to vector<2x50xf32>
    %cst_17 = arith.constant dense<0.000000e+00> : vector<2x50xf32>
    %37 = tpu.matmul %29, %1, %cst_17 {dimension_numbers = #tpu.dot_dimension_numbers<[1], [0], [0], [1], [0, 0, 1, 1], [], []>} : vector<2x50xf32>, vector<50x50xf32>, vector<2x50xf32> -> vector<2x50xf32>
    %38 = arith.addf %36, %37 : vector<2x50xf32>
    %39 = math.tanh %38 : vector<2x50xf32>
    %cst_18 = arith.constant dense<0.000000e+00> : vector<2x50xf32>
    %40 = tpu.matmul %39, %3, %cst_18 {dimension_numbers = #tpu.dot_dimension_numbers<[1], [0], [0], [1], [0, 0, 1, 1], [], []>} : vector<2x50xf32>, vector<50x50xf32>, vector<2x50xf32> -> vector<2x50xf32>
    %cst_19 = arith.constant dense<0.000000e+00> : vector<2x50xf32>
    %41 = tpu.matmul %34, %5, %cst_19 {dimension_numbers = #tpu.dot_dimension_numbers<[1], [0], [0], [1], [0, 0, 1, 1], [], []>} : vector<2x50xf32>, vector<50x50xf32>, vector<2x50xf32> -> vector<2x50xf32>
    %42 = arith.addf %40, %41 : vector<2x50xf32>
    %43 = arith.addf %42, %14 : vector<2x50xf32>
    %44 = math.tanh %43 : vector<2x50xf32>
    %45 = vector.extract_strided_slice %24 {offsets = [0, 2, 0], sizes = [2, 1, 50], strides = [1, 1, 1]} : vector<2x8x50xf32> to vector<2x1x50xf32>
    %46 = vector.shape_cast %45 : vector<2x1x50xf32> to vector<2x50xf32>
    %cst_20 = arith.constant dense<0.000000e+00> : vector<2x50xf32>
    %47 = tpu.matmul %39, %1, %cst_20 {dimension_numbers = #tpu.dot_dimension_numbers<[1], [0], [0], [1], [0, 0, 1, 1], [], []>} : vector<2x50xf32>, vector<50x50xf32>, vector<2x50xf32> -> vector<2x50xf32>
    %48 = arith.addf %46, %47 : vector<2x50xf32>
    %49 = math.tanh %48 : vector<2x50xf32>
    %cst_21 = arith.constant dense<0.000000e+00> : vector<2x50xf32>
    %50 = tpu.matmul %49, %3, %cst_21 {dimension_numbers = #tpu.dot_dimension_numbers<[1], [0], [0], [1], [0, 0, 1, 1], [], []>} : vector<2x50xf32>, vector<50x50xf32>, vector<2x50xf32> -> vector<2x50xf32>
    %cst_22 = arith.constant dense<0.000000e+00> : vector<2x50xf32>
    %51 = tpu.matmul %44, %5, %cst_22 {dimension_numbers = #tpu.dot_dimension_numbers<[1], [0], [0], [1], [0, 0, 1, 1], [], []>} : vector<2x50xf32>, vector<50x50xf32>, vector<2x50xf32> -> vector<2x50xf32>
    %52 = arith.addf %50, %51 : vector<2x50xf32>
    %53 = arith.addf %52, %14 : vector<2x50xf32>
    %54 = math.tanh %53 : vector<2x50xf32>
    %55 = vector.extract_strided_slice %24 {offsets = [0, 3, 0], sizes = [2, 1, 50], strides = [1, 1, 1]} : vector<2x8x50xf32> to vector<2x1x50xf32>
    %56 = vector.shape_cast %55 : vector<2x1x50xf32> to vector<2x50xf32>
    %cst_23 = arith.constant dense<0.000000e+00> : vector<2x50xf32>
    %57 = tpu.matmul %49, %1, %cst_23 {dimension_numbers = #tpu.dot_dimension_numbers<[1], [0], [0], [1], [0, 0, 1, 1], [], []>} : vector<2x50xf32>, vector<50x50xf32>, vector<2x50xf32> -> vector<2x50xf32>
    %58 = arith.addf %56, %57 : vector<2x50xf32>
    %59 = math.tanh %58 : vector<2x50xf32>
    %cst_24 = arith.constant dense<0.000000e+00> : vector<2x50xf32>
    %60 = tpu.matmul %59, %3, %cst_24 {dimension_numbers = #tpu.dot_dimension_numbers<[1], [0], [0], [1], [0, 0, 1, 1], [], []>} : vector<2x50xf32>, vector<50x50xf32>, vector<2x50xf32> -> vector<2x50xf32>
    %cst_25 = arith.constant dense<0.000000e+00> : vector<2x50xf32>
    %61 = tpu.matmul %54, %5, %cst_25 {dimension_numbers = #tpu.dot_dimension_numbers<[1], [0], [0], [1], [0, 0, 1, 1], [], []>} : vector<2x50xf32>, vector<50x50xf32>, vector<2x50xf32> -> vector<2x50xf32>
    %62 = arith.addf %60, %61 : vector<2x50xf32>
    %63 = arith.addf %62, %14 : vector<2x50xf32>
    %64 = math.tanh %63 : vector<2x50xf32>
    %65 = vector.extract_strided_slice %24 {offsets = [0, 4, 0], sizes = [2, 1, 50], strides = [1, 1, 1]} : vector<2x8x50xf32> to vector<2x1x50xf32>
    %66 = vector.shape_cast %65 : vector<2x1x50xf32> to vector<2x50xf32>
    %cst_26 = arith.constant dense<0.000000e+00> : vector<2x50xf32>
    %67 = tpu.matmul %59, %1, %cst_26 {dimension_numbers = #tpu.dot_dimension_numbers<[1], [0], [0], [1], [0, 0, 1, 1], [], []>} : vector<2x50xf32>, vector<50x50xf32>, vector<2x50xf32> -> vector<2x50xf32>
    %68 = arith.addf %66, %67 : vector<2x50xf32>
    %69 = math.tanh %68 : vector<2x50xf32>
    %cst_27 = arith.constant dense<0.000000e+00> : vector<2x50xf32>
    %70 = tpu.matmul %69, %3, %cst_27 {dimension_numbers = #tpu.dot_dimension_numbers<[1], [0], [0], [1], [0, 0, 1, 1], [], []>} : vector<2x50xf32>, vector<50x50xf32>, vector<2x50xf32> -> vector<2x50xf32>
    %cst_28 = arith.constant dense<0.000000e+00> : vector<2x50xf32>
    %71 = tpu.matmul %64, %5, %cst_28 {dimension_numbers = #tpu.dot_dimension_numbers<[1], [0], [0], [1], [0, 0, 1, 1], [], []>} : vector<2x50xf32>, vector<50x50xf32>, vector<2x50xf32> -> vector<2x50xf32>
    %72 = arith.addf %70, %71 : vector<2x50xf32>
    %73 = arith.addf %72, %14 : vector<2x50xf32>
    %74 = math.tanh %73 : vector<2x50xf32>
    %75 = vector.extract_strided_slice %24 {offsets = [0, 5, 0], sizes = [2, 1, 50], strides = [1, 1, 1]} : vector<2x8x50xf32> to vector<2x1x50xf32>
    %76 = vector.shape_cast %75 : vector<2x1x50xf32> to vector<2x50xf32>
    %cst_29 = arith.constant dense<0.000000e+00> : vector<2x50xf32>
    %77 = tpu.matmul %69, %1, %cst_29 {dimension_numbers = #tpu.dot_dimension_numbers<[1], [0], [0], [1], [0, 0, 1, 1], [], []>} : vector<2x50xf32>, vector<50x50xf32>, vector<2x50xf32> -> vector<2x50xf32>
    %78 = arith.addf %76, %77 : vector<2x50xf32>
    %79 = math.tanh %78 : vector<2x50xf32>
    %cst_30 = arith.constant dense<0.000000e+00> : vector<2x50xf32>
    %80 = tpu.matmul %79, %3, %cst_30 {dimension_numbers = #tpu.dot_dimension_numbers<[1], [0], [0], [1], [0, 0, 1, 1], [], []>} : vector<2x50xf32>, vector<50x50xf32>, vector<2x50xf32> -> vector<2x50xf32>
    %cst_31 = arith.constant dense<0.000000e+00> : vector<2x50xf32>
    %81 = tpu.matmul %74, %5, %cst_31 {dimension_numbers = #tpu.dot_dimension_numbers<[1], [0], [0], [1], [0, 0, 1, 1], [], []>} : vector<2x50xf32>, vector<50x50xf32>, vector<2x50xf32> -> vector<2x50xf32>
    %82 = arith.addf %80, %81 : vector<2x50xf32>
    %83 = arith.addf %82, %14 : vector<2x50xf32>
    %84 = math.tanh %83 : vector<2x50xf32>
    %85 = vector.extract_strided_slice %24 {offsets = [0, 6, 0], sizes = [2, 1, 50], strides = [1, 1, 1]} : vector<2x8x50xf32> to vector<2x1x50xf32>
    %86 = vector.shape_cast %85 : vector<2x1x50xf32> to vector<2x50xf32>
    %cst_32 = arith.constant dense<0.000000e+00> : vector<2x50xf32>
    %87 = tpu.matmul %79, %1, %cst_32 {dimension_numbers = #tpu.dot_dimension_numbers<[1], [0], [0], [1], [0, 0, 1, 1], [], []>} : vector<2x50xf32>, vector<50x50xf32>, vector<2x50xf32> -> vector<2x50xf32>
    %88 = arith.addf %86, %87 : vector<2x50xf32>
    %89 = math.tanh %88 : vector<2x50xf32>
    %cst_33 = arith.constant dense<0.000000e+00> : vector<2x50xf32>
    %90 = tpu.matmul %89, %3, %cst_33 {dimension_numbers = #tpu.dot_dimension_numbers<[1], [0], [0], [1], [0, 0, 1, 1], [], []>} : vector<2x50xf32>, vector<50x50xf32>, vector<2x50xf32> -> vector<2x50xf32>
    %cst_34 = arith.constant dense<0.000000e+00> : vector<2x50xf32>
    %91 = tpu.matmul %84, %5, %cst_34 {dimension_numbers = #tpu.dot_dimension_numbers<[1], [0], [0], [1], [0, 0, 1, 1], [], []>} : vector<2x50xf32>, vector<50x50xf32>, vector<2x50xf32> -> vector<2x50xf32>
    %92 = arith.addf %90, %91 : vector<2x50xf32>
    %93 = arith.addf %92, %14 : vector<2x50xf32>
    %94 = math.tanh %93 : vector<2x50xf32>
    %95 = vector.extract_strided_slice %24 {offsets = [0, 7, 0], sizes = [2, 1, 50], strides = [1, 1, 1]} : vector<2x8x50xf32> to vector<2x1x50xf32>
    %96 = vector.shape_cast %95 : vector<2x1x50xf32> to vector<2x50xf32>
    %cst_35 = arith.constant dense<0.000000e+00> : vector<2x50xf32>
    %97 = tpu.matmul %89, %1, %cst_35 {dimension_numbers = #tpu.dot_dimension_numbers<[1], [0], [0], [1], [0, 0, 1, 1], [], []>} : vector<2x50xf32>, vector<50x50xf32>, vector<2x50xf32> -> vector<2x50xf32>
    %98 = arith.addf %96, %97 : vector<2x50xf32>
    %99 = math.tanh %98 : vector<2x50xf32>
    %cst_36 = arith.constant dense<0.000000e+00> : vector<2x50xf32>
    %100 = tpu.matmul %99, %3, %cst_36 {dimension_numbers = #tpu.dot_dimension_numbers<[1], [0], [0], [1], [0, 0, 1, 1], [], []>} : vector<2x50xf32>, vector<50x50xf32>, vector<2x50xf32> -> vector<2x50xf32>
    %cst_37 = arith.constant dense<0.000000e+00> : vector<2x50xf32>
    %101 = tpu.matmul %94, %5, %cst_37 {dimension_numbers = #tpu.dot_dimension_numbers<[1], [0], [0], [1], [0, 0, 1, 1], [], []>} : vector<2x50xf32>, vector<50x50xf32>, vector<2x50xf32> -> vector<2x50xf32>
    %102 = arith.addf %100, %101 : vector<2x50xf32>
    %103 = arith.addf %102, %14 : vector<2x50xf32>
    %104 = math.tanh %103 : vector<2x50xf32>
    %cst_38 = arith.constant dense<0.000000e+00> : vector<2x50xf32>
    %105 = tpu.matmul %104, %7, %cst_38 {dimension_numbers = #tpu.dot_dimension_numbers<[1], [0], [0], [1], [0, 0, 1, 1], [], []>} : vector<2x50xf32>, vector<50x50xf32>, vector<2x50xf32> -> vector<2x50xf32>
    %106 = vector.broadcast %12 : vector<1x50xf32> to vector<2x50xf32>
    %107 = arith.addf %105, %106 : vector<2x50xf32>
    %108 = vector.extract_strided_slice %107 {offsets = [0, 0], sizes = [2, 3], strides = [1, 1]} : vector<2x50xf32> to vector<2x3xf32>
    %c0_39 = arith.constant 0 : index
    %c0_40 = arith.constant 0 : index
    %109 = vector.load %arg4[%c0_39, %c0_40] : memref<2x3xf32, #tpu.memory_space<vmem>>, vector<2x3xf32>
    tpu.vector_store %arg4[%c0_39, %c0_40], %108 {strides = array<i32>} : memref<2x3xf32, #tpu.memory_space<vmem>>, vector<2x3xf32>,
    return
  }
  func.func @transform_0(%arg0: i32) -> (i32, i32, i32) {
    %c0_i32 = arith.constant 0 : i32
    %c0_i32_0 = arith.constant 0 : i32
    %c0_i32_1 = arith.constant 0 : i32
    return %arg0, %c0_i32, %c0_i32_0 : i32, i32, i32
  }
  func.func @transform_1(%arg0: i32) -> (i32, i32, i32) {
    %c0_i32 = arith.constant 0 : i32
    %c0_i32_0 = arith.constant 0 : i32
    %c0_i32_1 = arith.constant 0 : i32
    %c0_i32_2 = arith.constant 0 : i32
    return %c0_i32, %c0_i32_0, %c0_i32_1 : i32, i32, i32
  }
  func.func @transform_2(%arg0: i32) -> (i32, i32) {
    %c0_i32 = arith.constant 0 : i32
    %c0_i32_0 = arith.constant 0 : i32
    %c0_i32_1 = arith.constant 0 : i32
    return %c0_i32, %c0_i32_0 : i32, i32
  }
  func.func @transform_3(%arg0: i32) -> (i32, i32) {
    %c0_i32 = arith.constant 0 : i32
    %c0_i32_0 = arith.constant 0 : i32
    return %arg0, %c0_i32 : i32, i32
  }
}

</mosaic_0001>

<bundles_post_ra>
// kernel: tpu_custom_call.1
= control target key start
LH: loop header
LB: loop body
LE: loop exit
PB: predicated region body
PF: predicated region fallthrough
CT: control target
= control target key end

     0   :  { %vm79_vm0 = vcmask 1041408   ;;  %v2802_v1 = vmov 0.0   ;;  %vm2803_vm1 = vmmov 0   ;;  %v2804_v5 = vmov 0   ;;  %s3464_s0 = inlined_call_operand.vmem [shape: f32[2,8,1], index: 0, kind: input, shape index: {}]   ;;  %s3465_s1 = inlined_call_operand.vmem [shape: f32[4,50,50], index: 1, kind: input, shape index: {}]   ;;  %s3466_s2 = inlined_call_operand.vmem [shape: f32[4,50], index: 2, kind: input, shape index: {}]   ;;  %s3467_s3 = inlined_call_operand.hbm [shape: f32[2,3], index: 3, kind: output, shape index: {}]  }
   0x1   :  { %v2829_v0 = vld [vmem:[%s3465_s1 + $0x30] sm:$0x3]  ;;  %2296 = vmatprep.subr.mxu0 %v2802_v1  ;;  %v2835_v2 = vld [vmem:[%s3465_s1 + $0x28] sm:$0xff]  ;;  %2313 = vmatprep.subr.mxu1 %v2802_v1  ;;  %v2849_v4 = vld [vmem:[%s3465_s1 + $0x20] sm:$0xff] }
   0x2   :  { %2297 = vmatpush3.msk.msra.mxu0 %vm79_vm0, %v2829_v0  ;;  %2310 = vmatprep.mubr.msk.f32.mxu0 %vm2803_vm1, %v2802_v1  ;;  %v52_v3 = vld [vmem:[%s3464_s0 + $0x8] sm:$0xff]  ;;  %v2854_v6 = vld [vmem:[%s3465_s1 + $0xa0] sm:$0x3] }
   0x3   :  { %2298 = vmatprep.subr.mxu0 %v2802_v1  ;;  %2725 = vset.pattern.permute.xlu0 %v2804_v5 }
   0x4   :  { %8 = vsyncpa [#allocation3], 0  ;;  %2299 = vmatpush3.msra.mxu0 %v2835_v2  ;;  %60 = vperm.xlu0 %2725, %v52_v3   ;;  %v2861_v7 = vld [vmem:[%s3465_s1 + $0x18] sm:$0xff]  ;;  %v51_v8 = vld [vmem:[%s3464_s0] sm:$0xff]  ;;  %v47_v25 = vlaneseq  ;;  %vm237_vm2 = vcmask 1041409   ;;  %vm75_vm3 = vcmask 408576  }
   0x5   :  { %2300 = vmatprep.subr.mxu0 %v2802_v1  ;;  %2314 = vmatpush3.msk.msra.mxu1 %vm79_vm0, %v2854_v6  ;;  %v2873_v9 = vld [vmem:[%s3465_s1 + $0x98] sm:$0xff]  ;;  %v2879_v10 = vld [vmem:[%s3465_s1 + $0x10] sm:$0xff]  ;;  %v2892_v12 = vld [vmem:[%s3465_s1 + $0x8] sm:$0xff]  ;;  %vm2011_vm4 = vcmask 17408  }
   0x6   :  { %2301 = vmatpush3.msra.mxu0 %v2849_v4  ;;  %2315 = vmatprep.subr.mxu1 %v2802_v1  ;;  %v2885_v11 = vld [vmem:[%s3465_s1 + $0x90] sm:$0xff]  ;;  %v2901_v13 = vld [vmem:[%s3465_s1] sm:$0xff]  ;;  %v2916_v14 = vld [vmem:[%s3465_s1 + $0x88] sm:$0xff]  ;;  %v3009_v26 = vshrl.u32 %v47_v25, 7 }
   0x7   :  { %2302 = vmatprep.subr.mxu0 %v2802_v1  ;;  %2316 = vmatpush3.msra.mxu1 %v2873_v9  ;;  %v2923_v15 = vld [vmem:[%s3465_s1 + $0x80] sm:$0xff]  ;;  %v2930_v16 = vld [vmem:[%s3465_s1 + $0x78] sm:$0xff]  ;;  %v2937_v17 = vld [vmem:[%s3465_s1 + $0x70] sm:$0xff] }
   0x8   :  { %2303 = vmatpush3.msra.mxu0 %v2861_v7  ;;  %55 = vperm.xlu0 %2725, %v51_v8   ;;  %v2945_v18 = vld [vmem:[%s3465_s1 + $0x68] sm:$0x3]  ;;  %v2958_v19 = vld [vmem:[%s3465_s1 + $0x60] sm:$0xff]  ;;  %v2967_v20 = vld [vmem:[%s3465_s1 + $0x58] sm:$0xff]  ;;  %v65_v28 = vsub.s32 2, %v3009_v26  ;;  %v71_v31 = vsub.s32 0, %v3009_v26 }
   0x9   :  { %2304 = vmatprep.subr.mxu0 %v2802_v1  ;;  %2317 = vmatprep.subr.mxu1 %v2802_v1  ;;  %v2976_v21 = vld [vmem:[%s3465_s1 + $0x50] sm:$0xff]  ;;  %v2985_v22 = vld [vmem:[%s3465_s1 + $0x48] sm:$0xff]  ;;  %v2994_v23 = vld [vmem:[%s3465_s1 + $0x40] sm:$0xff]  ;;  %v49_v49 = vsub.s32 1, %v3009_v26 }
   0xa   :  { %2305 = vmatpush3.msra.mxu0 %v2879_v10  ;;  %2318 = vmatpush3.msra.mxu1 %v2885_v11  ;;  %v3002_v24 = vld [vmem:[%s3465_s1 + $0x38] sm:$0xff]  ;;  %v46_v29 = vld [vmem:[%s3466_s2] sm:$0xf] }
   0xb   :  { %2306 = vmatprep.subr.mxu0 %v2802_v1  ;;  %2319 = vmatprep.subr.mxu1 %v2802_v1  ;;  %v66_v30 = vrot.slane %v46_v29, %v65_v28  ;;  %v72_v33 = vrot.slane %v46_v29, %v71_v31  ;;  %v3060_v50 = vrot.slane %v46_v29, %v49_v49 }
   0xc   :  { %2307 = vmatpush3.msra.mxu0 %v2892_v12  ;;  %2327 = vmatprep.mubr.msk.f32.mxu1 %vm2803_vm1, %v2802_v1 }
   0xd   :  { %2308 = vmatprep.subr.mxu0 %v2802_v1  ;;  %2320 = vmatpush3.msra.mxu1 %v2916_v14 }
   0xe   :  { %2309 = vmatpush3.msra.mxu0 %v2901_v13  ;;  %2321 = vmatprep.subr.mxu1 %v2802_v1 }
   0xf   :  { %2311 = vmatmul.mubr.f32.vlgmr.msra.gmra.mxu0 %v2802_v1  ;;  %2330 = vmatprep.subr.mxu0 %v2802_v1 }
  0x10   :  { %2344 = vmatprep.mubr.msk.f32.mxu0 %vm2803_vm1, %v2802_v1  ;;  %2322 = vmatpush3.msra.mxu1 %v2923_v15 }
  0x11   :  { %2323 = vmatprep.subr.mxu1 %v2802_v1  ;;  %2331 = vmatpush3.msk.msra.mxu0 %vm79_vm0, %v2945_v18 }
  0x12   :  { %2324 = vmatpush3.msra.mxu1 %v2930_v16  ;;  %2332 = vmatprep.subr.mxu0 %v2802_v1 }
  0x13   :  { %2325 = vmatprep.subr.mxu1 %v2802_v1  ;;  %2333 = vmatpush3.msra.mxu0 %v2958_v19 }
  0x14   :  { %2326 = vmatpush3.msra.mxu1 %v2937_v17  ;;  %2334 = vmatprep.subr.mxu0 %v2802_v1 }
  0x15   :  { %2328 = vmatmul.mubr.f32.vlgmr.msra.gmra.mxu1 %v2802_v1  ;;  %2347 = vmatprep.subr.mxu1 %v2802_v1 }
  0x16   :  { %2348 = vmatpush3.msk.msra.mxu1 %vm79_vm0, %v2829_v0  ;;  %2361 = vmatprep.mubr.msk.f32.mxu1 %vm2803_vm1, %v2802_v1 }
  0x17   :  { %2349 = vmatprep.subr.mxu1 %v2802_v1  ;;  %2335 = vmatpush3.msra.mxu0 %v2967_v20 }
  0x18   :  { %2350 = vmatpush3.msra.mxu1 %v2835_v2  ;;  %2336 = vmatprep.subr.mxu0 %v2802_v1 }
  0x19   :  { %2351 = vmatprep.subr.mxu1 %v2802_v1  ;;  %2337 = vmatpush3.msra.mxu0 %v2976_v21 }
  0x1a   :  { %2352 = vmatpush3.msra.mxu1 %v2849_v4  ;;  %2338 = vmatprep.subr.mxu0 %v2802_v1 }
  0x1b   :  { %2353 = vmatprep.subr.mxu1 %v2802_v1  ;;  %2339 = vmatpush3.msra.mxu0 %v2985_v22 }
  0x1c   :  { %2354 = vmatpush3.msra.mxu1 %v2861_v7  ;;  %2340 = vmatprep.subr.mxu0 %v2802_v1 }
  0x1d   :  { %2355 = vmatprep.subr.mxu1 %v2802_v1  ;;  %2341 = vmatpush3.msra.mxu0 %v2994_v23 }
  0x1e   :  { %2356 = vmatpush3.msra.mxu1 %v2879_v10  ;;  %2342 = vmatprep.subr.mxu0 %v2802_v1 }
  0x1f   :  { %2357 = vmatprep.subr.mxu1 %v2802_v1  ;;  %2343 = vmatpush3.msra.mxu0 %v3002_v24 }
  0x20   :  { %2358 = vmatpush3.msra.mxu1 %v2892_v12  ;;  %2364 = vmatprep.subr.mxu0 %v2802_v1 }
  0x21   :  { %2359 = vmatprep.subr.mxu1 %v2802_v1 }
  0x22   :  { %2360 = vmatpush3.msra.mxu1 %v2901_v13 }
  0x23   :  { %2381 = vmatprep.subr.mxu1 %v2802_v1 }
  0x7f   :  { %v61_v27 = vpop.permute.xlu0 %60 }
  0x80   :  { %v68_v35 = vmul.f32 %v66_v30, %v61_v27 }
  0x82   :  { %v3018_v38 = vadd.f32 %v72_v33, %v68_v35 }
  0x83   :  { %v56_v32 = vpop.permute.xlu0 %55 }
  0x84   :  { %v67_v34 = vmul.f32 %v66_v30, %v56_v32 }
  0x86   :  { %v3016_v36 = vadd.f32 %v72_v33, %v67_v34 }
  0xcf   :  { %v149_v37 = vpop.f32.mrf.mxu0 }
  0xd0   :  { %v154_v39 = vrot.slane %v149_v37, 1  ;;  %v157_v41 = vadd.f32 %v149_v37, %v3016_v36 }
  0xd1   :  { %v2312_v40 = vpop.f32.mrf.mxu0 }
  0xd2   :  { %v158_v42 = vadd.f32 %v154_v39, %v3018_v38 }
  0xd4   :  { %2726 = vtanh.f32 %v158_v42 }
  0xd5   :  { %2728 = vtanh.f32 %v157_v41  ;;  %v230_v47 = vpop.f32.mrf.mxu1 }
  0xd7   :  { %v2329_v48 = vpop.f32.mrf.mxu1 }
  0xe1   :  { %v2727_v43 = vpop.eup %2726 }
  0xe2   :  { %v236_v44 = vrot.slane %v2727_v43, 7  ;;  %v2729_v45 = vpop.eup %2728 }
  0xe4   :  { %v238_v46 = vsel %vm237_vm2, %v236_v44, %v2729_v45 }
  0xe5   :  { %2345 = vmatmul.mubr.msk.f32.vlgmr.msra.gmra.mxu0 %vm75_vm3, %v238_v46  ;;  %2362 = vmatmul.mubr.msk.f32.vlgmr.msra.gmra.mxu1 %vm75_vm3, %v238_v46 }
  0xe6   :  { %2365 = vmatpush3.msk.msra.mxu0 %vm79_vm0, %v2854_v6  ;;  %2382 = vmatpush3.msk.msra.mxu1 %vm79_vm0, %v2945_v18 }
  0xe7   :  { %2366 = vmatprep.subr.mxu0 %v2802_v1  ;;  %2383 = vmatprep.subr.mxu1 %v2802_v1 }
  0xe8   :  { %2367 = vmatpush3.msra.mxu0 %v2873_v9  ;;  %2384 = vmatpush3.msra.mxu1 %v2958_v19 }
  0xe9   :  { %2368 = vmatprep.subr.mxu0 %v2802_v1  ;;  %2385 = vmatprep.subr.mxu1 %v2802_v1 }
  0xea   :  { %2369 = vmatpush3.msra.mxu0 %v2885_v11  ;;  %2386 = vmatpush3.msra.mxu1 %v2967_v20 }
  0xeb   :  { %2370 = vmatprep.subr.mxu0 %v2802_v1  ;;  %2387 = vmatprep.subr.mxu1 %v2802_v1 }
  0xec   :  { %2371 = vmatpush3.msra.mxu0 %v2916_v14  ;;  %2388 = vmatpush3.msra.mxu1 %v2976_v21 }
  0xed   :  { %2372 = vmatprep.subr.mxu0 %v2802_v1  ;;  %2389 = vmatprep.subr.mxu1 %v2802_v1 }
  0xee   :  { %2373 = vmatpush3.msra.mxu0 %v2923_v15  ;;  %2390 = vmatpush3.msra.mxu1 %v2985_v22 }
  0xef   :  { %2374 = vmatprep.subr.mxu0 %v2802_v1  ;;  %2378 = vmatprep.mubr.msk.f32.mxu0 %vm2803_vm1, %v2802_v1 }
  0xf0   :  { %2375 = vmatpush3.msra.mxu0 %v2930_v16  ;;  %2391 = vmatprep.subr.mxu1 %v2802_v1 }
  0xf1   :  { %2376 = vmatprep.subr.mxu0 %v2802_v1  ;;  %2392 = vmatpush3.msra.mxu1 %v2994_v23 }
  0xf2   :  { %2377 = vmatpush3.msra.mxu0 %v2937_v17  ;;  %2393 = vmatprep.subr.mxu1 %v2802_v1 }
  0xf3   :  { %2398 = vmatprep.subr.mxu0 %v2802_v1  ;;  %2394 = vmatpush3.msra.mxu1 %v3002_v24 }
  0xf4   :  { %2395 = vmatprep.mubr.msk.f32.mxu1 %vm2803_vm1, %v2802_v1  ;;  %2415 = vmatprep.subr.mxu1 %v2802_v1 }
 0x1a5   :  { %v310_v51 = vpop.f32.mrf.mxu0  ;;  %v382_v52 = vpop.f32.mrf.mxu1 }
 0x1a6   :  { %v311_v53 = vadd.f32 %v310_v51, %v230_v47  ;;  %v387_v54 = vrot.slane %v382_v52, 7  ;;  %v391_v59 = vadd.f32 %v382_v52, %v3018_v38 }
 0x1a7   :  { %v2346_v55 = vpop.f32.mrf.mxu0  ;;  %v2363_v56 = vpop.f32.mrf.mxu1 }
 0x1a8   :  { %v314_v57 = vadd.f32 %v311_v53, %v3060_v50  ;;  %v390_v58 = vadd.f32 %v387_v54, %v3016_v36 }
 0x1aa   :  { %2730 = vtanh.f32 %v314_v57 }
 0x1ab   :  { %2732 = vtanh.f32 %v390_v58 }
 0x1ac   :  { %2734 = vtanh.f32 %v391_v59 }
 0x1b7   :  { %v2731_v60 = vpop.eup %2730 }
 0x1b8   :  { %v2733_v61 = vpop.eup %2732  ;;  %2379 = vmatmul.mubr.msk.f32.vlgmr.msra.gmra.mxu0 %vm75_vm3, %v2731_v60 }
 0x1b9   :  { %v469_v62 = vrot.slane %v2733_v61, 1  ;;  %2399 = vmatpush3.msk.msra.mxu0 %vm79_vm0, %v2829_v0  ;;  %2412 = vmatprep.mubr.msk.f32.mxu0 %vm2803_vm1, %v2802_v1  ;;  %v2735_v63 = vpop.eup %2734 }
 0x1ba   :  { %2400 = vmatprep.subr.mxu0 %v2802_v1 }
 0x1bb   :  { %2401 = vmatpush3.msra.mxu0 %v2835_v2  ;;  %v470_v3 = vsel %vm237_vm2, %v2735_v63, %v469_v62 }
 0x1bc   :  { %2396 = vmatmul.mubr.msk.f32.vlgmr.msra.gmra.mxu1 %vm75_vm3, %v470_v3  ;;  %2402 = vmatprep.subr.mxu0 %v2802_v1 }
 0x1bd   :  { %2403 = vmatpush3.msra.mxu0 %v2849_v4  ;;  %2416 = vmatpush3.msk.msra.mxu1 %vm79_vm0, %v2854_v6 }
 0x1be   :  { %2404 = vmatprep.subr.mxu0 %v2802_v1  ;;  %2417 = vmatprep.subr.mxu1 %v2802_v1 }
 0x1bf   :  { %2405 = vmatpush3.msra.mxu0 %v2861_v7  ;;  %2418 = vmatpush3.msra.mxu1 %v2873_v9 }
 0x1c0   :  { %2406 = vmatprep.subr.mxu0 %v2802_v1  ;;  %2419 = vmatprep.subr.mxu1 %v2802_v1 }
 0x1c1   :  { %2407 = vmatpush3.msra.mxu0 %v2879_v10  ;;  %2420 = vmatpush3.msra.mxu1 %v2885_v11 }
 0x1c2   :  { %2408 = vmatprep.subr.mxu0 %v2802_v1  ;;  %2421 = vmatprep.subr.mxu1 %v2802_v1 }
 0x1c3   :  { %2409 = vmatpush3.msra.mxu0 %v2892_v12  ;;  %2422 = vmatpush3.msra.mxu1 %v2916_v14 }
 0x1c4   :  { %2410 = vmatprep.subr.mxu0 %v2802_v1  ;;  %2423 = vmatprep.subr.mxu1 %v2802_v1 }
 0x1c5   :  { %2411 = vmatpush3.msra.mxu0 %v2901_v13  ;;  %2424 = vmatpush3.msra.mxu1 %v2923_v15 }
 0x1c6   :  { %2413 = vmatmul.mubr.msk.f32.vlgmr.msra.gmra.mxu0 %vm75_vm3, %v470_v3  ;;  %2425 = vmatprep.subr.mxu1 %v2802_v1 }
 0x1c7   :  { %2426 = vmatpush3.msra.mxu1 %v2930_v16  ;;  %2429 = vmatprep.mubr.msk.f32.mxu1 %vm2803_vm1, %v2802_v1 }
 0x1c8   :  { %2427 = vmatprep.subr.mxu1 %v2802_v1  ;;  %2432 = vmatprep.subr.mxu0 %v2802_v1 }
 0x1c9   :  { %2428 = vmatpush3.msra.mxu1 %v2937_v17  ;;  %2433 = vmatpush3.msk.msra.mxu0 %vm79_vm0, %v2945_v18 }
 0x1ca   :  { %2449 = vmatprep.subr.mxu1 %v2802_v1  ;;  %2434 = vmatprep.subr.mxu0 %v2802_v1 }
 0x1cb   :  { %2435 = vmatpush3.msra.mxu0 %v2958_v19  ;;  %2446 = vmatprep.mubr.msk.f32.mxu0 %vm2803_vm1, %v2802_v1 }
 0x1cc   :  { %2436 = vmatprep.subr.mxu0 %v2802_v1 }
 0x1cd   :  { %2437 = vmatpush3.msra.mxu0 %v2967_v20 }
 0x1ce   :  { %2438 = vmatprep.subr.mxu0 %v2802_v1 }
 0x1cf   :  { %2439 = vmatpush3.msra.mxu0 %v2976_v21 }
 0x1d0   :  { %2440 = vmatprep.subr.mxu0 %v2802_v1 }
 0x1d1   :  { %2441 = vmatpush3.msra.mxu0 %v2985_v22 }
 0x1d2   :  { %2442 = vmatprep.subr.mxu0 %v2802_v1 }
 0x1d3   :  { %2443 = vmatpush3.msra.mxu0 %v2994_v23 }
 0x1d4   :  { %2444 = vmatprep.subr.mxu0 %v2802_v1 }
 0x1d5   :  { %2445 = vmatpush3.msra.mxu0 %v3002_v24 }
 0x1d6   :  { %2466 = vmatprep.subr.mxu0 %v2802_v1 }
 0x278   :  { %v463_v5 = vpop.f32.mrf.mxu0 }
 0x27a   :  { %v2380_v8 = vpop.f32.mrf.mxu0 }
 0x27c   :  { %v539_v25 = vpop.f32.mrf.mxu1 }
 0x27d   :  { %v540_v27 = vadd.f32 %v539_v25, %v463_v5 }
 0x27e   :  { %v2397_v28 = vpop.f32.mrf.mxu1 }
 0x27f   :  { %v543_v29 = vadd.f32 %v540_v27, %v3060_v50 }
 0x281   :  { %2736 = vtanh.f32 %v543_v29 }
 0x286   :  { %v611_v30 = vpop.f32.mrf.mxu0 }
 0x287   :  { %v616_v31 = vrot.slane %v611_v30, 6  ;;  %v617_v32 = vrot.slane %v611_v30, 7 }
 0x288   :  { %v2414_v33 = vpop.f32.mrf.mxu0 }
 0x289   :  { %v620_v34 = vadd.f32 %v616_v31, %v3016_v36  ;;  %v621_v35 = vadd.f32 %v617_v32, %v3018_v38 }
 0x28b   :  { %2738 = vtanh.f32 %v620_v34 }
 0x28c   :  { %2740 = vtanh.f32 %v621_v35 }
 0x28e   :  { %v2737_v37 = vpop.eup %2736 }
 0x28f   :  { %2430 = vmatmul.mubr.msk.f32.vlgmr.msra.gmra.mxu1 %vm75_vm3, %v2737_v37 }
 0x290   :  { %2450 = vmatpush3.msk.msra.mxu1 %vm79_vm0, %v2829_v0  ;;  %2463 = vmatprep.mubr.msk.f32.mxu1 %vm2803_vm1, %v2802_v1 }
 0x291   :  { %2451 = vmatprep.subr.mxu1 %v2802_v1 }
 0x292   :  { %2452 = vmatpush3.msra.mxu1 %v2835_v2 }
 0x293   :  { %2453 = vmatprep.subr.mxu1 %v2802_v1 }
 0x294   :  { %2454 = vmatpush3.msra.mxu1 %v2849_v4 }
 0x295   :  { %2455 = vmatprep.subr.mxu1 %v2802_v1 }
 0x296   :  { %2456 = vmatpush3.msra.mxu1 %v2861_v7 }
 0x297   :  { %2457 = vmatprep.subr.mxu1 %v2802_v1 }
 0x298   :  { %v2739_v39 = vpop.eup %2738  ;;  %2458 = vmatpush3.msra.mxu1 %v2879_v10 }
 0x299   :  { %v2741_v40 = vpop.eup %2740  ;;  %v699_v41 = vrot.slane %v2739_v39, 2  ;;  %2459 = vmatprep.subr.mxu1 %v2802_v1 }
 0x29a   :  { %v700_v42 = vrot.slane %v2741_v40, 1  ;;  %2460 = vmatpush3.msra.mxu1 %v2892_v12 }
 0x29b   :  { %2461 = vmatprep.subr.mxu1 %v2802_v1 }
 0x29c   :  { %2462 = vmatpush3.msra.mxu1 %v2901_v13  ;;  %v701_v43 = vsel %vm237_vm2, %v700_v42, %v699_v41 }
 0x29d   :  { %2447 = vmatmul.mubr.msk.f32.vlgmr.msra.gmra.mxu0 %vm75_vm3, %v701_v43  ;;  %2464 = vmatmul.mubr.msk.f32.vlgmr.msra.gmra.mxu1 %vm75_vm3, %v701_v43 }
 0x29e   :  { %2467 = vmatpush3.msk.msra.mxu0 %vm79_vm0, %v2854_v6  ;;  %2483 = vmatprep.subr.mxu1 %v2802_v1 }
 0x29f   :  { %2468 = vmatprep.subr.mxu0 %v2802_v1  ;;  %2484 = vmatpush3.msk.msra.mxu1 %vm79_vm0, %v2945_v18 }
 0x2a0   :  { %2469 = vmatpush3.msra.mxu0 %v2873_v9  ;;  %2485 = vmatprep.subr.mxu1 %v2802_v1 }
 0x2a1   :  { %2470 = vmatprep.subr.mxu0 %v2802_v1  ;;  %2486 = vmatpush3.msra.mxu1 %v2958_v19 }
 0x2a2   :  { %2471 = vmatpush3.msra.mxu0 %v2885_v11  ;;  %2487 = vmatprep.subr.mxu1 %v2802_v1 }
 0x2a3   :  { %2472 = vmatprep.subr.mxu0 %v2802_v1  ;;  %2488 = vmatpush3.msra.mxu1 %v2967_v20 }
 0x2a4   :  { %2473 = vmatpush3.msra.mxu0 %v2916_v14  ;;  %2489 = vmatprep.subr.mxu1 %v2802_v1 }
 0x2a5   :  { %2474 = vmatprep.subr.mxu0 %v2802_v1  ;;  %2490 = vmatpush3.msra.mxu1 %v2976_v21 }
 0x2a6   :  { %2475 = vmatpush3.msra.mxu0 %v2923_v15  ;;  %2491 = vmatprep.subr.mxu1 %v2802_v1 }
 0x2a7   :  { %2476 = vmatprep.subr.mxu0 %v2802_v1  ;;  %2492 = vmatpush3.msra.mxu1 %v2985_v22 }
 0x2a8   :  { %2477 = vmatpush3.msra.mxu0 %v2930_v16  ;;  %2480 = vmatprep.mubr.msk.f32.mxu0 %vm2803_vm1, %v2802_v1 }
 0x2a9   :  { %2478 = vmatprep.subr.mxu0 %v2802_v1  ;;  %2493 = vmatprep.subr.mxu1 %v2802_v1 }
 0x2aa   :  { %2479 = vmatpush3.msra.mxu0 %v2937_v17  ;;  %2494 = vmatpush3.msra.mxu1 %v2994_v23 }
 0x2ab   :  { %2500 = vmatprep.subr.mxu0 %v2802_v1  ;;  %2495 = vmatprep.subr.mxu1 %v2802_v1 }
 0x2ac   :  { %2496 = vmatpush3.msra.mxu1 %v3002_v24  ;;  %2497 = vmatprep.mubr.msk.f32.mxu1 %vm2803_vm1, %v2802_v1 }
 0x2ad   :  { %2517 = vmatprep.subr.mxu1 %v2802_v1 }
 0x34f   :  { %v693_v44 = vpop.f32.mrf.mxu1 }
 0x351   :  { %v2431_v45 = vpop.f32.mrf.mxu1 }
 0x35d   :  { %v770_v46 = vpop.f32.mrf.mxu0  ;;  %v842_v47 = vpop.f32.mrf.mxu1 }
 0x35e   :  { %v771_v48 = vadd.f32 %v770_v46, %v693_v44  ;;  %v847_v49 = vrot.slane %v842_v47, 5  ;;  %v848_v51 = vrot.slane %v842_v47, 6 }
 0x35f   :  { %v2448_v52 = vpop.f32.mrf.mxu0  ;;  %v2465_v53 = vpop.f32.mrf.mxu1 }
 0x360   :  { %v774_v54 = vadd.f32 %v771_v48, %v3060_v50  ;;  %v851_v55 = vadd.f32 %v847_v49, %v3016_v36  ;;  %v852_v56 = vadd.f32 %v848_v51, %v3018_v38 }
 0x362   :  { %2742 = vtanh.f32 %v774_v54 }
 0x363   :  { %2744 = vtanh.f32 %v851_v55 }
 0x364   :  { %2746 = vtanh.f32 %v852_v56 }
 0x36f   :  { %v2743_v57 = vpop.eup %2742 }
 0x370   :  { %v2745_v58 = vpop.eup %2744  ;;  %2481 = vmatmul.mubr.msk.f32.vlgmr.msra.gmra.mxu0 %vm75_vm3, %v2743_v57 }
 0x371   :  { %v2747_v59 = vpop.eup %2746  ;;  %v930_v60 = vrot.slane %v2745_v58, 3  ;;  %2501 = vmatpush3.msk.msra.mxu0 %vm79_vm0, %v2829_v0  ;;  %2514 = vmatprep.mubr.msk.f32.mxu0 %vm2803_vm1, %v2802_v1 }
 0x372   :  { %v931_v61 = vrot.slane %v2747_v59, 2  ;;  %2502 = vmatprep.subr.mxu0 %v2802_v1 }
 0x373   :  { %2503 = vmatpush3.msra.mxu0 %v2835_v2 }
 0x374   :  { %v932_v62 = vsel %vm237_vm2, %v931_v61, %v930_v60  ;;  %2504 = vmatprep.subr.mxu0 %v2802_v1 }
 0x375   :  { %2498 = vmatmul.mubr.msk.f32.vlgmr.msra.gmra.mxu1 %vm75_vm3, %v932_v62  ;;  %2505 = vmatpush3.msra.mxu0 %v2849_v4 }
 0x376   :  { %2506 = vmatprep.subr.mxu0 %v2802_v1  ;;  %2518 = vmatpush3.msk.msra.mxu1 %vm79_vm0, %v2854_v6 }
 0x377   :  { %2507 = vmatpush3.msra.mxu0 %v2861_v7  ;;  %2519 = vmatprep.subr.mxu1 %v2802_v1 }
 0x378   :  { %2508 = vmatprep.subr.mxu0 %v2802_v1  ;;  %2520 = vmatpush3.msra.mxu1 %v2873_v9 }
 0x379   :  { %2509 = vmatpush3.msra.mxu0 %v2879_v10  ;;  %2521 = vmatprep.subr.mxu1 %v2802_v1 }
 0x37a   :  { %2510 = vmatprep.subr.mxu0 %v2802_v1  ;;  %2522 = vmatpush3.msra.mxu1 %v2885_v11 }
 0x37b   :  { %2511 = vmatpush3.msra.mxu0 %v2892_v12  ;;  %2523 = vmatprep.subr.mxu1 %v2802_v1 }
 0x37c   :  { %2512 = vmatprep.subr.mxu0 %v2802_v1  ;;  %2524 = vmatpush3.msra.mxu1 %v2916_v14 }
 0x37d   :  { %2513 = vmatpush3.msra.mxu0 %v2901_v13  ;;  %2525 = vmatprep.subr.mxu1 %v2802_v1 }
 0x37e   :  { %2515 = vmatmul.mubr.msk.f32.vlgmr.msra.gmra.mxu0 %vm75_vm3, %v932_v62  ;;  %2526 = vmatpush3.msra.mxu1 %v2923_v15 }
 0x37f   :  { %2527 = vmatprep.subr.mxu1 %v2802_v1  ;;  %2531 = vmatprep.mubr.msk.f32.mxu1 %vm2803_vm1, %v2802_v1 }
 0x380   :  { %2528 = vmatpush3.msra.mxu1 %v2930_v16  ;;  %2534 = vmatprep.subr.mxu0 %v2802_v1 }
 0x381   :  { %2529 = vmatprep.subr.mxu1 %v2802_v1  ;;  %2535 = vmatpush3.msk.msra.mxu0 %vm79_vm0, %v2945_v18 }
 0x382   :  { %2530 = vmatpush3.msra.mxu1 %v2937_v17  ;;  %2536 = vmatprep.subr.mxu0 %v2802_v1 }
 0x383   :  { %2551 = vmatprep.subr.mxu1 %v2802_v1  ;;  %2537 = vmatpush3.msra.mxu0 %v2958_v19 }
 0x384   :  { %2538 = vmatprep.subr.mxu0 %v2802_v1  ;;  %2548 = vmatprep.mubr.msk.f32.mxu0 %vm2803_vm1, %v2802_v1 }
 0x385   :  { %2539 = vmatpush3.msra.mxu0 %v2967_v20 }
 0x386   :  { %2540 = vmatprep.subr.mxu0 %v2802_v1 }
 0x387   :  { %2541 = vmatpush3.msra.mxu0 %v2976_v21 }
 0x388   :  { %2542 = vmatprep.subr.mxu0 %v2802_v1 }
 0x389   :  { %2543 = vmatpush3.msra.mxu0 %v2985_v22 }
 0x38a   :  { %2544 = vmatprep.subr.mxu0 %v2802_v1 }
 0x38b   :  { %2545 = vmatpush3.msra.mxu0 %v2994_v23 }
 0x38c   :  { %2546 = vmatprep.subr.mxu0 %v2802_v1 }
 0x38d   :  { %2547 = vmatpush3.msra.mxu0 %v3002_v24 }
 0x38e   :  { %2568 = vmatprep.subr.mxu0 %v2802_v1 }
 0x430   :  { %v924_v63 = vpop.f32.mrf.mxu0 }
 0x432   :  { %v2482_v3 = vpop.f32.mrf.mxu0 }
 0x435   :  { %v1001_v5 = vpop.f32.mrf.mxu1 }
 0x436   :  { %v1002_v8 = vadd.f32 %v1001_v5, %v924_v63 }
 0x437   :  { %v2499_v25 = vpop.f32.mrf.mxu1 }
 0x438   :  { %v1005_v27 = vadd.f32 %v1002_v8, %v3060_v50 }
 0x43a   :  { %2748 = vtanh.f32 %v1005_v27 }
 0x43e   :  { %v1073_v28 = vpop.f32.mrf.mxu0 }
 0x43f   :  { %v1078_v29 = vrot.slane %v1073_v28, 4  ;;  %v1079_v30 = vrot.slane %v1073_v28, 5  ;;  %v2774_v28 = vld [vmem:[%s3465_s1 + $0x30] sm:$0x3] }
 0x440   :  { %v2516_v31 = vpop.f32.mrf.mxu0 }
 0x441   :  { %v1082_v32 = vadd.f32 %v1078_v29, %v3016_v36  ;;  %v1083_v33 = vadd.f32 %v1079_v30, %v3018_v38  ;;  %v2775_v29 = vld [vmem:[%s3465_s1 + $0x28] sm:$0xff] }
 0x443   :  { %2750 = vtanh.f32 %v1082_v32 }
 0x444   :  { %2752 = vtanh.f32 %v1083_v33 }
 0x447   :  { %v2749_v34 = vpop.eup %2748 }
 0x448   :  { %2532 = vmatmul.mubr.msk.f32.vlgmr.msra.gmra.mxu1 %vm75_vm3, %v2749_v34 }
 0x449   :  { %2552 = vmatpush3.msk.msra.mxu1 %vm79_vm0, %v2829_v0  ;;  %2565 = vmatprep.mubr.msk.f32.mxu1 %vm2803_vm1, %v2802_v1 }
 0x44a   :  { %2553 = vmatprep.subr.mxu1 %v2802_v1 }
 0x44b   :  { %2554 = vmatpush3.msra.mxu1 %v2835_v2 }
 0x44c   :  { %2555 = vmatprep.subr.mxu1 %v2802_v1 }
 0x44d   :  { %2556 = vmatpush3.msra.mxu1 %v2849_v4 }
 0x44e   :  { %2557 = vmatprep.subr.mxu1 %v2802_v1 }
 0x44f   :  { %2558 = vmatpush3.msra.mxu1 %v2861_v7 }
 0x450   :  { %v2751_v35 = vpop.eup %2750  ;;  %2559 = vmatprep.subr.mxu1 %v2802_v1 }
 0x451   :  { %v2753_v37 = vpop.eup %2752  ;;  %v1161_v39 = vrot.slane %v2751_v35, 4  ;;  %2560 = vmatpush3.msra.mxu1 %v2879_v10 }
 0x452   :  { %v1162_v40 = vrot.slane %v2753_v37, 3  ;;  %2561 = vmatprep.subr.mxu1 %v2802_v1 }
 0x453   :  { %2562 = vmatpush3.msra.mxu1 %v2892_v12 }
 0x454   :  { %2563 = vmatprep.subr.mxu1 %v2802_v1  ;;  %v1163_v41 = vsel %vm237_vm2, %v1162_v40, %v1161_v39 }
 0x455   :  { %2564 = vmatpush3.msra.mxu1 %v2901_v13  ;;  %2549 = vmatmul.mubr.msk.f32.vlgmr.msra.gmra.mxu0 %vm75_vm3, %v1163_v41 }
 0x456   :  { %2566 = vmatmul.mubr.msk.f32.vlgmr.msra.gmra.mxu1 %vm75_vm3, %v1163_v41  ;;  %2569 = vmatpush3.msk.msra.mxu0 %vm79_vm0, %v2854_v6 }
 0x457   :  { %2570 = vmatprep.subr.mxu0 %v2802_v1  ;;  %2585 = vmatprep.subr.mxu1 %v2802_v1 }
 0x458   :  { %2571 = vmatpush3.msra.mxu0 %v2873_v9  ;;  %2586 = vmatpush3.msk.msra.mxu1 %vm79_vm0, %v2945_v18 }
 0x459   :  { %2572 = vmatprep.subr.mxu0 %v2802_v1  ;;  %2587 = vmatprep.subr.mxu1 %v2802_v1 }
 0x45a   :  { %2573 = vmatpush3.msra.mxu0 %v2885_v11  ;;  %2588 = vmatpush3.msra.mxu1 %v2958_v19 }
 0x45b   :  { %2574 = vmatprep.subr.mxu0 %v2802_v1  ;;  %2589 = vmatprep.subr.mxu1 %v2802_v1 }
 0x45c   :  { %2575 = vmatpush3.msra.mxu0 %v2916_v14  ;;  %2590 = vmatpush3.msra.mxu1 %v2967_v20 }
 0x45d   :  { %2576 = vmatprep.subr.mxu0 %v2802_v1  ;;  %2591 = vmatprep.subr.mxu1 %v2802_v1 }
 0x45e   :  { %2577 = vmatpush3.msra.mxu0 %v2923_v15  ;;  %2592 = vmatpush3.msra.mxu1 %v2976_v21 }
 0x45f   :  { %2578 = vmatprep.subr.mxu0 %v2802_v1  ;;  %2593 = vmatprep.subr.mxu1 %v2802_v1 }
 0x460   :  { %2579 = vmatpush3.msra.mxu0 %v2930_v16  ;;  %2594 = vmatpush3.msra.mxu1 %v2985_v22 }
 0x461   :  { %2580 = vmatprep.subr.mxu0 %v2802_v1  ;;  %2582 = vmatprep.mubr.msk.f32.mxu0 %vm2803_vm1, %v2802_v1 }
 0x462   :  { %2581 = vmatpush3.msra.mxu0 %v2937_v17  ;;  %2595 = vmatprep.subr.mxu1 %v2802_v1 }
 0x463   :  { %2602 = vmatprep.subr.mxu0 %v2802_v1  ;;  %2596 = vmatpush3.msra.mxu1 %v2994_v23 }
 0x464   :  { %2597 = vmatprep.subr.mxu1 %v2802_v1  ;;  %2599 = vmatprep.mubr.msk.f32.mxu1 %vm2803_vm1, %v2802_v1 }
 0x465   :  { %2598 = vmatpush3.msra.mxu1 %v3002_v24 }
 0x466   :  { %2619 = vmatprep.subr.mxu1 %v2802_v1 }
 0x508   :  { %v1155_v42 = vpop.f32.mrf.mxu1 }
 0x50a   :  { %v2533_v43 = vpop.f32.mrf.mxu1 }
 0x50b   :  { %v2044_v43 = vld [vmem:[%s3465_s1 + $0xc0] sm:$0xff] }
 0x515   :  { %v1232_v44 = vpop.f32.mrf.mxu0 }
 0x516   :  { %v1233_v45 = vadd.f32 %v1232_v44, %v1155_v42  ;;  %v1304_v46 = vpop.f32.mrf.mxu1  ;;  %v2045_v42 = vld [vmem:[%s3465_s1 + $0xc8] sm:$0xff]  ;;  %v2043_v44 = vld [vmem:[%s3465_s1 + $0xb8] sm:$0xff] }
 0x517   :  { %v1309_v47 = vrot.slane %v1304_v46, 3  ;;  %v1310_v48 = vrot.slane %v1304_v46, 4  ;;  %v2550_v49 = vpop.f32.mrf.mxu0  ;;  %v2041_v46 = vld [vmem:[%s3465_s1 + $0xa8] sm:$0xff] }
 0x518   :  { %v1236_v51 = vadd.f32 %v1233_v45, %v3060_v50  ;;  %v2567_v52 = vpop.f32.mrf.mxu1  ;;  %v2042_v45 = vld [vmem:[%s3465_s1 + $0xb0] sm:$0xff] }
 0x519   :  { %v1313_v53 = vadd.f32 %v1309_v47, %v3016_v36  ;;  %v1314_v54 = vadd.f32 %v1310_v48, %v3018_v38 }
 0x51a   :  { %2754 = vtanh.f32 %v1236_v51 }
 0x51b   :  { %2756 = vtanh.f32 %v1313_v53 }
 0x51c   :  { %2758 = vtanh.f32 %v1314_v54 }
 0x527   :  { %v2755_v55 = vpop.eup %2754 }
 0x528   :  { %v2757_v56 = vpop.eup %2756  ;;  %2583 = vmatmul.mubr.msk.f32.vlgmr.msra.gmra.mxu0 %vm75_vm3, %v2755_v55  ;;  %v1933_v55 = vsub.s32 3, %v3009_v26 }
 0x529   :  { %v2759_v57 = vpop.eup %2758  ;;  %v1392_v58 = vrot.slane %v2757_v56, 5  ;;  %2603 = vmatpush3.msk.msra.mxu0 %vm79_vm0, %v2829_v0  ;;  %2616 = vmatprep.mubr.msk.f32.mxu0 %vm2803_vm1, %v2802_v1  ;;  %v2779_v56 = vld [vmem:[%s3466_s2] sm:$0xf] }
 0x52a   :  { %v1393_v59 = vrot.slane %v2759_v57, 4  ;;  %2604 = vmatprep.subr.mxu0 %v2802_v1  ;;  %v1934_v57 = vrot.slane %v2779_v56, %v1933_v55 }
 0x52b   :  { %2605 = vmatpush3.msra.mxu0 %v2835_v2 }
 0x52c   :  { %v1394_v60 = vsel %vm237_vm2, %v1393_v59, %v1392_v58  ;;  %2606 = vmatprep.subr.mxu0 %v2802_v1 }
 0x52d   :  { %2600 = vmatmul.mubr.msk.f32.vlgmr.msra.gmra.mxu1 %vm75_vm3, %v1394_v60  ;;  %2607 = vmatpush3.msra.mxu0 %v2849_v4 }
 0x52e   :  { %2608 = vmatprep.subr.mxu0 %v2802_v1  ;;  %2620 = vmatpush3.msk.msra.mxu1 %vm79_vm0, %v2854_v6 }
 0x52f   :  { %2609 = vmatpush3.msra.mxu0 %v2861_v7  ;;  %2621 = vmatprep.subr.mxu1 %v2802_v1 }
 0x530   :  { %2610 = vmatprep.subr.mxu0 %v2802_v1  ;;  %2622 = vmatpush3.msra.mxu1 %v2873_v9 }
 0x531   :  { %2611 = vmatpush3.msra.mxu0 %v2879_v10  ;;  %2623 = vmatprep.subr.mxu1 %v2802_v1 }
 0x532   :  { %2612 = vmatprep.subr.mxu0 %v2802_v1  ;;  %2624 = vmatpush3.msra.mxu1 %v2885_v11 }
 0x533   :  { %2613 = vmatpush3.msra.mxu0 %v2892_v12  ;;  %2625 = vmatprep.subr.mxu1 %v2802_v1 }
 0x534   :  { %2614 = vmatprep.subr.mxu0 %v2802_v1  ;;  %2626 = vmatpush3.msra.mxu1 %v2916_v14 }
 0x535   :  { %2615 = vmatpush3.msra.mxu0 %v2901_v13  ;;  %2627 = vmatprep.subr.mxu1 %v2802_v1 }
 0x536   :  { %2617 = vmatmul.mubr.msk.f32.vlgmr.msra.gmra.mxu0 %vm75_vm3, %v1394_v60  ;;  %2628 = vmatpush3.msra.mxu1 %v2923_v15 }
 0x537   :  { %2629 = vmatprep.subr.mxu1 %v2802_v1  ;;  %2633 = vmatprep.mubr.msk.f32.mxu1 %vm2803_vm1, %v2802_v1 }
 0x538   :  { %2630 = vmatpush3.msra.mxu1 %v2930_v16  ;;  %2636 = vmatprep.subr.mxu0 %v2802_v1 }
 0x539   :  { %2631 = vmatprep.subr.mxu1 %v2802_v1  ;;  %2637 = vmatpush3.msk.msra.mxu0 %vm79_vm0, %v2945_v18 }
 0x53a   :  { %2632 = vmatpush3.msra.mxu1 %v2937_v17  ;;  %2638 = vmatprep.subr.mxu0 %v2802_v1 }
 0x53b   :  { %2653 = vmatprep.subr.mxu1 %v2802_v1  ;;  %2639 = vmatpush3.msra.mxu0 %v2958_v19 }
 0x53c   :  { %2640 = vmatprep.subr.mxu0 %v2802_v1  ;;  %2650 = vmatprep.mubr.msk.f32.mxu0 %vm2803_vm1, %v2802_v1 }
 0x53d   :  { %2641 = vmatpush3.msra.mxu0 %v2967_v20 }
 0x53e   :  { %2642 = vmatprep.subr.mxu0 %v2802_v1 }
 0x53f   :  { %2643 = vmatpush3.msra.mxu0 %v2976_v21 }
 0x540   :  { %2644 = vmatprep.subr.mxu0 %v2802_v1 }
 0x541   :  { %2645 = vmatpush3.msra.mxu0 %v2985_v22 }
 0x542   :  { %2646 = vmatprep.subr.mxu0 %v2802_v1 }
 0x543   :  { %2647 = vmatpush3.msra.mxu0 %v2994_v23 }
 0x544   :  { %2648 = vmatprep.subr.mxu0 %v2802_v1 }
 0x545   :  { %2649 = vmatpush3.msra.mxu0 %v3002_v24 }
 0x546   :  { %2670 = vmatprep.subr.mxu0 %v2802_v1 }
 0x5e8   :  { %v1386_v0 = vpop.f32.mrf.mxu0 }
 0x5ea   :  { %v2584_v2 = vpop.f32.mrf.mxu0 }
 0x5ed   :  { %v1463_v6 = vpop.f32.mrf.mxu1 }
 0x5ee   :  { %v1464_v9 = vadd.f32 %v1463_v6, %v1386_v0 }
 0x5ef   :  { %v2601_v11 = vpop.f32.mrf.mxu1 }
 0x5f0   :  { %v1467_v61 = vadd.f32 %v1464_v9, %v3060_v50 }
 0x5f2   :  { %2760 = vtanh.f32 %v1467_v61 }
 0x5f6   :  { %v1535_v62 = vpop.f32.mrf.mxu0 }
 0x5f7   :  { %v1540_v63 = vrot.slane %v1535_v62, 2  ;;  %v1541_v3 = vrot.slane %v1535_v62, 3 }
 0x5f8   :  { %v2618_v5 = vpop.f32.mrf.mxu0 }
 0x5f9   :  { %v1544_v8 = vadd.f32 %v1540_v63, %v3016_v36  ;;  %v1545_v25 = vadd.f32 %v1541_v3, %v3018_v38 }
 0x5fb   :  { %2762 = vtanh.f32 %v1544_v8 }
 0x5fc   :  { %2764 = vtanh.f32 %v1545_v25 }
 0x5ff   :  { %v2761_v27 = vpop.eup %2760 }
 0x600   :  { %2634 = vmatmul.mubr.msk.f32.vlgmr.msra.gmra.mxu1 %vm75_vm3, %v2761_v27 }
 0x601   :  { %2654 = vmatpush3.msk.msra.mxu1 %vm79_vm0, %v2774_v28  ;;  %2667 = vmatprep.mubr.msk.f32.mxu1 %vm2803_vm1, %v2802_v1 }
 0x602   :  { %2655 = vmatprep.subr.mxu1 %v2802_v1 }
 0x603   :  { %2656 = vmatpush3.msra.mxu1 %v2775_v29 }
 0x604   :  { %2657 = vmatprep.subr.mxu1 %v2802_v1 }
 0x605   :  { %2658 = vmatpush3.msra.mxu1 %v2849_v4 }
 0x606   :  { %2659 = vmatprep.subr.mxu1 %v2802_v1 }
 0x607   :  { %2660 = vmatpush3.msra.mxu1 %v2861_v7  ;;  %v2776_v7 = vld [vmem:[%s3465_s1 + $0xa0] sm:$0x3] }
 0x608   :  { %v2763_v30 = vpop.eup %2762  ;;  %2661 = vmatprep.subr.mxu1 %v2802_v1 }
 0x609   :  { %v2765_v31 = vpop.eup %2764  ;;  %v1623_v32 = vrot.slane %v2763_v30, 6  ;;  %2662 = vmatpush3.msra.mxu1 %v2879_v10  ;;  %v2777_v10 = vld [vmem:[%s3465_s1 + $0x98] sm:$0xff] }
 0x60a   :  { %v1624_v33 = vrot.slane %v2765_v31, 5  ;;  %2663 = vmatprep.subr.mxu1 %v2802_v1 }
 0x60b   :  { %2664 = vmatpush3.msra.mxu1 %v2892_v12  ;;  %v2778_v12 = vld [vmem:[%s3465_s1 + $0x90] sm:$0xff] }
 0x60c   :  { %2665 = vmatprep.subr.mxu1 %v2802_v1  ;;  %v1625_v4 = vsel %vm237_vm2, %v1624_v33, %v1623_v32 }
 0x60d   :  { %2666 = vmatpush3.msra.mxu1 %v2901_v13  ;;  %2651 = vmatmul.mubr.msk.f32.vlgmr.msra.gmra.mxu0 %vm75_vm3, %v1625_v4 }
 0x60e   :  { %2668 = vmatmul.mubr.msk.f32.vlgmr.msra.gmra.mxu1 %vm75_vm3, %v1625_v4  ;;  %2671 = vmatpush3.msk.msra.mxu0 %vm79_vm0, %v2776_v7 }
 0x60f   :  { %2672 = vmatprep.subr.mxu0 %v2802_v1  ;;  %2687 = vmatprep.subr.mxu1 %v2802_v1 }
 0x610   :  { %2673 = vmatpush3.msra.mxu0 %v2777_v10  ;;  %2688 = vmatpush3.msk.msra.mxu1 %vm79_vm0, %v2945_v18 }
 0x611   :  { %2674 = vmatprep.subr.mxu0 %v2802_v1  ;;  %2689 = vmatprep.subr.mxu1 %v2802_v1 }
 0x612   :  { %2675 = vmatpush3.msra.mxu0 %v2778_v12  ;;  %2690 = vmatpush3.msra.mxu1 %v2958_v19 }
 0x613   :  { %2676 = vmatprep.subr.mxu0 %v2802_v1  ;;  %2691 = vmatprep.subr.mxu1 %v2802_v1 }
 0x614   :  { %2677 = vmatpush3.msra.mxu0 %v2916_v14  ;;  %2692 = vmatpush3.msra.mxu1 %v2967_v20 }
 0x615   :  { %2678 = vmatprep.subr.mxu0 %v2802_v1  ;;  %2693 = vmatprep.subr.mxu1 %v2802_v1 }
 0x616   :  { %2679 = vmatpush3.msra.mxu0 %v2923_v15  ;;  %2694 = vmatpush3.msra.mxu1 %v2976_v21 }
 0x617   :  { %2680 = vmatprep.subr.mxu0 %v2802_v1  ;;  %2695 = vmatprep.subr.mxu1 %v2802_v1 }
 0x618   :  { %2681 = vmatpush3.msra.mxu0 %v2930_v16  ;;  %2696 = vmatpush3.msra.mxu1 %v2985_v22 }
 0x619   :  { %2682 = vmatprep.subr.mxu0 %v2802_v1  ;;  %2684 = vmatprep.mubr.msk.f32.mxu0 %vm2803_vm1, %v2802_v1 }
 0x61a   :  { %2683 = vmatpush3.msra.mxu0 %v2937_v17  ;;  %2697 = vmatprep.subr.mxu1 %v2802_v1 }
 0x61b   :  { %2698 = vmatpush3.msra.mxu1 %v2994_v23  ;;  %2701 = vmatprep.mubr.msk.f32.mxu1 %vm2803_vm1, %v2802_v1 }
 0x61c   :  { %2699 = vmatprep.subr.mxu1 %v2802_v1  ;;  %2704 = vmatprep.subr.mxu0 %v2802_v1 }
 0x61d   :  { %2700 = vmatpush3.msra.mxu1 %v3002_v24 }
 0x6c0   :  { %v1617_v13 = vpop.f32.mrf.mxu1 }
 0x6c2   :  { %v2635_v14 = vpop.f32.mrf.mxu1 }
 0x6cd   :  { %v1694_v15 = vpop.f32.mrf.mxu0 }
 0x6ce   :  { %v1695_v16 = vadd.f32 %v1694_v15, %v1617_v13  ;;  %v1766_v18 = vpop.f32.mrf.mxu1 }
 0x6cf   :  { %v1771_v19 = vrot.slane %v1766_v18, 1  ;;  %v1772_v17 = vrot.slane %v1766_v18, 2  ;;  %v2652_v20 = vpop.f32.mrf.mxu0 }
 0x6d0   :  { %v1698_v21 = vadd.f32 %v1695_v16, %v3060_v50  ;;  %v2669_v22 = vpop.f32.mrf.mxu1 }
 0x6d1   :  { %v1775_v23 = vadd.f32 %v1771_v19, %v3016_v36  ;;  %v1776_v34 = vadd.f32 %v1772_v17, %v3018_v38  ;;  %v2047_v36 = vld [vmem:[%s3465_s1 + $0xd8] sm:$0x3]  ;;  %v2046_v38 = vld [vmem:[%s3465_s1 + $0xd0] sm:$0xff]  ;;  %s2805_s1 = smov [#allocation2]  }
 0x6d2   :  { %2766 = vtanh.f32 %v1698_v21  ;;  %s2019_s0 = sshll.u32 %s2805_s1, 4  ;;  %s2020_s0 = int_to_ptr.vmem [resolvable:$true] %s2019_s0 }
 0x6d3   :  { %2768 = vtanh.f32 %v1775_v23  ;;  %s2780_s30 = scalar_lea.vmem %s2020_s0, 32  ;;  %p2785_p1 = scmp.lt.s32.totalorder %s2020_s0, %s2020_s0 }
 0x6d4   :  { %2770 = vtanh.f32 %v1776_v34  ;;  %p2781_p0 = scmp.ne.s32.totalorder %s2020_s0, %s2780_s30  ;;  %p2786_p2 = scmp.lt.s32.totalorder %s2780_s30, %s2780_s30 }
 0x6d6   :  { %p2787_p3 = por %p2786_p2, %p2785_p1 }
 0x6d8   :  { %p2788_p4 = pnand %p2787_p3, %p2781_p0 }
 0x6df   :  { %v2767_v35 = vpop.eup %2766 }
 0x6e0   :  { %v2769_v24 = vpop.eup %2768  ;;  %2685 = vmatmul.mubr.msk.f32.vlgmr.msra.gmra.mxu0 %vm75_vm3, %v2767_v35 }
 0x6e1   :  { %v2771_v37 = vpop.eup %2770  ;;  %v1854_v39 = vrot.slane %v2769_v24, 7  ;;  %2718 = vmatprep.mubr.msk.f32.mxu0 %vm2803_vm1, %v2802_v1  ;;  %2705 = vmatpush3.msk.msra.mxu0 %vm79_vm0, %v2047_v36 }
 0x6e2   :  { %v1855_v40 = vrot.slane %v2771_v37, 6  ;;  %2706 = vmatprep.subr.mxu0 %v2802_v1 }
 0x6e3   :  { %2707 = vmatpush3.msra.mxu0 %v2046_v38 }
 0x6e4   :  { %v1856_v41 = vsel %vm237_vm2, %v1855_v40, %v1854_v39  ;;  %2708 = vmatprep.subr.mxu0 %v2802_v1 }
 0x6e5   :  { %2702 = vmatmul.mubr.msk.f32.vlgmr.msra.gmra.mxu1 %vm75_vm3, %v1856_v41  ;;  %2709 = vmatpush3.msra.mxu0 %v2045_v42 }
 0x6e6   :  { %2710 = vmatprep.subr.mxu0 %v2802_v1 }
 0x6e7   :  { %2711 = vmatpush3.msra.mxu0 %v2044_v43 }
 0x6e8   :  { %2712 = vmatprep.subr.mxu0 %v2802_v1 }
 0x6e9   :  { %2713 = vmatpush3.msra.mxu0 %v2043_v44 }
 0x6ea   :  { %2714 = vmatprep.subr.mxu0 %v2802_v1 }
 0x6eb   :  { %2715 = vmatpush3.msra.mxu0 %v2042_v45 }
 0x6ec   :  { %2716 = vmatprep.subr.mxu0 %v2802_v1 }
 0x6ed   :  { %2717 = vmatpush3.msra.mxu0 %v2041_v46 }
 0x7a0   :  { %v1848_v47 = vpop.f32.mrf.mxu0 }
 0x7a2   :  { %v2686_v48 = vpop.f32.mrf.mxu0 }
 0x7a5   :  { %v1925_v49 = vpop.f32.mrf.mxu1 }
 0x7a6   :  { %v1926_v51 = vadd.f32 %v1925_v49, %v1848_v47 }
 0x7a7   :  { %v2703_v52 = vpop.f32.mrf.mxu1 }
 0x7a8   :  { %v1929_v53 = vadd.f32 %v1926_v51, %v3060_v50 }
 0x7aa   :  { %2772 = vtanh.f32 %v1929_v53 }
 0x7b7   :  { %v2773_v54 = vpop.eup %2772 }
 0x7b8   :  { %2719 = vmatmul.mubr.msk.f32.vlgmr.msra.gmra.mxu0 %vm75_vm3, %v2773_v54 }
 0x878   :  { %v2007_v1 = vpop.f32.mrf.mxu0 }
 0x879   :  { %v2008_v58 = vadd.f32 %v2007_v1, %v1934_v57 }
 0x87a   :  { %v2720_v59 = vpop.f32.mrf.mxu0 }
 0x87b   :  { %2012 = vst.msk [vmem:[#allocation2] sm:$0x3] %vm2011_vm4, %v2008_v58 }
 0x87c   :  { %2791 = shalt.err (!%p2788_p4)
}
 0x87d   :  { %2022 = dma.vmem_to_hbm [thread:$0]  %s2020_s0, 32, %s3467_s3, [#allocation3]  }
 0x87e   :  { %2800 = dma.done.wait [#allocation3], 32  }
 0x87f   :  { %2801 = vsyncadd [#allocation3], 4294967264 }
 0x880   :  { %2026 = vsyncpa [#allocation3], 1 }

</bundles_post_ra>
